<compile_context>
chip_gen: v7x
topology: tpu7x:2x2x1
jax: 0.10.0
libtpu: 0.0.40
codegen_flags: <defaults>
</compile_context>

<pallas_src>
import jax
import jax.numpy as jnp
from jax.experimental import pallas as pl
from jax.experimental.pallas import tpu as pltpu


def toy4_kernel(x_ref, m1_ref, b1_ref, m2_ref, b2_ref, o_ref):
    # x_ref : (9, t)  activation slab, lanes = N*H tile
    # m1_ref: (9, 9)  kron(I_C, w1)        -- first Linear for all channels
    # b1_ref: (9, 1)  tiled first-layer bias
    # m2_ref: (9, 9)  kron(wc, w4 @ w2)    -- fused Linear->Conv1x1->Linear
    # b2_ref: (9, 1)  folded bias of the linear tail
    a = x_ref[...]
    h = jnp.dot(m1_ref[...], a, preferred_element_type=jnp.float32) + b1_ref[...]
    h = jnp.maximum(h, 0.0)
    o_ref[...] = (jnp.dot(m2_ref[...], h, preferred_element_type=jnp.float32)
                  + b2_ref[...])


def _fold_params(params):
    """Fold the four layers into two 9x9 mixes + biases (kernel orientation)."""
    w1, b1 = params["w1"], params["b1"]
    w2, b2 = params["w2"], params["b2"]
    wc, bc = params["wc"].reshape(3, 3), params["bc"]
    w4, b4 = params["w4"], params["b4"]

    m1 = jnp.kron(jnp.eye(3, dtype=jnp.float32), w1)           # (9, 9)
    b1v = jnp.tile(b1, 3).reshape(9, 1)                        # (9, 1)

    w42 = w4 @ w2                                              # combined W-axis mix
    m2 = jnp.kron(wc, w42)                                     # (9, 9)
    # bias of the folded tail: b2 pushed through w4 & wc, bc pushed through w4, plus b4
    b2v = (jnp.outer(wc.sum(axis=1), w4 @ b2)
           + jnp.outer(bc, w4.sum(axis=1))
           + b4[None, :]).reshape(9, 1)                        # (9, 1)
    return m1, b1v, m2, b2v


def _pick_lane_tile(L):
    """Lane tile: multiple of 128, VMEM-budgeted, >=2 grid blocks when possible.

    Per-block footprint ~ 5 bufs * 16 padded sublanes * t * 4 B = 320*t bytes;
    t = 32768 -> ~10.5 MiB, inside every generation's scoped-VMEM budget.
    """
    LANE = 128
    MAX_T = 32768
    if L <= LANE:
        return L                                   # single full-extent block
    half = pl.cdiv(L, 2)                           # expose >= 2 blocks (v7x: 2 TCs)
    return min(MAX_T, pl.cdiv(half, LANE) * LANE)


def toy_model4_forward(x, params):
    """x: (N, C, H, W) float32 with C == W == 3. Returns same shape."""
    N, C, H, W = x.shape
    assert C == 3 and W == 3, "ToyModel4 expects 3 channels and 3 features"
    x = x.astype(jnp.float32)

    L = N * H
    # (N, C, H, W) -> (C, W, N, H) -> (C*W, N*H): lane axis is the long N*H axis.
    # allow_input_fusion lets XLA fuse this relayout into the pallas_call operand.
    x2 = x.transpose(1, 3, 0, 2).reshape(C * W, L)

    t = _pick_lane_tile(L)
    grid = (pl.cdiv(L, t),)                        # masked partial edge block; no pad/slice

    m1, b1v, m2, b2v = _fold_params(params)

    act_spec = pl.BlockSpec((C * W, t), lambda i: (0, i))
    w_spec = pl.BlockSpec((C * W, C * W), lambda i: (0, 0))
    b_spec = pl.BlockSpec((C * W, 1), lambda i: (0, 0))

    out2 = pl.pallas_call(
        toy4_kernel,
        out_shape=jax.ShapeDtypeStruct((C * W, L), jnp.float32),
        grid=grid,
        in_specs=[act_spec, w_spec, b_spec, w_spec, b_spec],
        out_specs=act_spec,
        input_output_aliases={0: 0},               # output reuses the x2 buffer
        compiler_params=pltpu.CompilerParams(
            dimension_semantics=("parallel",),
            vmem_limit_bytes=32 * 1024 * 1024,     # safe on v5e/v6e/v7x physical VMEM
            allow_input_fusion=[True, False, False, False, False],
        ),
        cost_estimate=pl.CostEstimate(
            flops=2 * 2 * 81 * L,                  # two 9x9 @ 9xL matmuls
            transcendentals=0,
            bytes_accessed=2 * 9 * L * 4,
        ),
    )(x2, m1, b1v, m2, b2v)

    # (C*W, N*H) -> (C, W, N, H) -> (N, C, H, W)
    return out2.reshape(C, W, N, H).transpose(2, 0, 3, 1)


def toy_model4_reference(x, p):
    """Pure-JAX reference matching the PyTorch forward semantics."""
    h = jnp.einsum("nchw,ow->ncho", x, p["w1"]) + p["b1"]
    h = jnp.maximum(h, 0.0)
    h = jnp.einsum("nchw,ow->ncho", h, p["w2"]) + p["b2"]
    h = (jnp.einsum("nchw,oc->nohw", h, p["wc"][:, :, 0, 0])
         + p["bc"][None, :, None, None])
    h = jnp.einsum("nchw,ow->ncho", h, p["w4"]) + p["b4"]
    return h


def init_params(key):
    ks = jax.random.split(key, 8)
    scale = 1.0 / jnp.sqrt(3.0)
    return {
        "w1": jax.random.uniform(ks[0], (3, 3), jnp.float32, -scale, scale),
        "b1": jax.random.uniform(ks[1], (3,), jnp.float32, -scale, scale),
        "w2": jax.random.uniform(ks[2], (3, 3), jnp.float32, -scale, scale),
        "b2": jax.random.uniform(ks[3], (3,), jnp.float32, -scale, scale),
        "wc": jax.random.uniform(ks[4], (3, 3, 1, 1), jnp.float32, -scale, scale),
        "bc": jax.random.uniform(ks[5], (3,), jnp.float32, -scale, scale),
        "w4": jax.random.uniform(ks[6], (3, 3), jnp.float32, -scale, scale),
        "b4": jax.random.uniform(ks[7], (3,), jnp.float32, -scale, scale),
    }


if __name__ == "__main__":
    key = jax.random.PRNGKey(0)
    k_x, k_x2, k_p = jax.random.split(key, 3)
    params = init_params(k_p)

    fwd = jax.jit(toy_model4_forward)

    # Small NCHW input: batch=2, channels=3 (Conv2d in_channels), H=16,
    # W=3 (Linear in_features) -> single full-extent block.
    x = jax.random.normal(k_x, (2, 3, 16, 3), jnp.float32)
    out = jax.block_until_ready(fwd(x, params))
    ref = jax.block_until_ready(toy_model4_reference(x, params))
    assert out.shape == (2, 3, 16, 3)
    assert jnp.allclose(out, ref, atol=1e-5, rtol=1e-4), "mismatch vs reference"

    # Second shape exercising the tiled path with a masked partial edge block
    # (L = 3*1000 = 3000 lanes -> tile 1536, grid = 2, last block partial).
    x_edge = jax.random.normal(k_x2, (3, 3, 1000, 3), jnp.float32)
    out_e = jax.block_until_ready(fwd(x_edge, params))
    ref_e = jax.block_until_ready(toy_model4_reference(x_edge, params))
    assert out_e.shape == (3, 3, 1000, 3)
    assert jnp.allclose(out_e, ref_e, atol=1e-5, rtol=1e-4), "edge-block mismatch"

    print("KERNEL_OK")
</pallas_src>

<mosaic_0001>
module attributes {stable_mosaic.version = 11 : i64} {
  func.func @toy4_kernel(%arg0: i32, %arg1: memref<9x32xf32, #tpu.memory_space<vmem>>, %arg2: memref<9x9xf32, #tpu.memory_space<vmem>>, %arg3: memref<9x1xf32, #tpu.memory_space<vmem>>, %arg4: memref<9x9xf32, #tpu.memory_space<vmem>>, %arg5: memref<9x1xf32, #tpu.memory_space<vmem>>, %arg6: memref<9x32xf32, #tpu.memory_space<vmem>>) attributes {dimension_semantics = [#tpu.dimension_semantics<parallel>], iteration_bounds = array<i64: 1>, scalar_prefetch = 0 : i64, scratch_operands = 0 : i64, tpu.core_type = #tpu.core_type<tc>, window_params = [{transform_indices = @transform_0, window_bounds = array<i64: 9, 32>}, {pipeline_mode = #tpu.pipeline_mode<synchronous>, transform_indices = @transform_1, window_bounds = array<i64: 9, 9>}, {pipeline_mode = #tpu.pipeline_mode<synchronous>, transform_indices = @transform_2, window_bounds = array<i64: 9, 1>}, {pipeline_mode = #tpu.pipeline_mode<synchronous>, transform_indices = @transform_3, window_bounds = array<i64: 9, 9>}, {pipeline_mode = #tpu.pipeline_mode<synchronous>, transform_indices = @transform_4, window_bounds = array<i64: 9, 1>}, {transform_indices = @transform_5, window_bounds = array<i64: 9, 32>}]} {
    %c0 = arith.constant 0 : index
    %c0_0 = arith.constant 0 : index
    %0 = vector.load %arg1[%c0, %c0_0] : memref<9x32xf32, #tpu.memory_space<vmem>>, vector<9x32xf32>
    %c0_1 = arith.constant 0 : index
    %c0_2 = arith.constant 0 : index
    %1 = vector.load %arg2[%c0_1, %c0_2] : memref<9x9xf32, #tpu.memory_space<vmem>>, vector<9x9xf32>
    %cst = arith.constant dense<0.000000e+00> : vector<9x32xf32>
    %2 = tpu.matmul %1, %0, %cst {dimension_numbers = #tpu.dot_dimension_numbers<[1], [0], [0], [1], [0, 0, 1, 1], [], []>} : vector<9x9xf32>, vector<9x32xf32>, vector<9x32xf32> -> vector<9x32xf32>
    %c0_3 = arith.constant 0 : index
    %c0_4 = arith.constant 0 : index
    %3 = vector.load %arg3[%c0_3, %c0_4] : memref<9x1xf32, #tpu.memory_space<vmem>>, vector<9x1xf32>
    %4 = vector.broadcast %3 : vector<9x1xf32> to vector<9x32xf32>
    %5 = arith.addf %2, %4 : vector<9x32xf32>
    %cst_5 = arith.constant 0.000000e+00 : f32
    %6 = vector.broadcast %cst_5 : f32 to vector<9x32xf32>
    %7 = arith.maximumf %5, %6 : vector<9x32xf32>
    %c0_6 = arith.constant 0 : index
    %c0_7 = arith.constant 0 : index
    %8 = vector.load %arg4[%c0_6, %c0_7] : memref<9x9xf32, #tpu.memory_space<vmem>>, vector<9x9xf32>
    %cst_8 = arith.constant dense<0.000000e+00> : vector<9x32xf32>
    %9 = tpu.matmul %8, %7, %cst_8 {dimension_numbers = #tpu.dot_dimension_numbers<[1], [0], [0], [1], [0, 0, 1, 1], [], []>} : vector<9x9xf32>, vector<9x32xf32>, vector<9x32xf32> -> vector<9x32xf32>
    %c0_9 = arith.constant 0 : index
    %c0_10 = arith.constant 0 : index
    %10 = vector.load %arg5[%c0_9, %c0_10] : memref<9x1xf32, #tpu.memory_space<vmem>>, vector<9x1xf32>
    %11 = vector.broadcast %10 : vector<9x1xf32> to vector<9x32xf32>
    %12 = arith.addf %9, %11 : vector<9x32xf32>
    %c0_11 = arith.constant 0 : index
    %c0_12 = arith.constant 0 : index
    %13 = vector.load %arg6[%c0_11, %c0_12] : memref<9x32xf32, #tpu.memory_space<vmem>>, vector<9x32xf32>
    tpu.vector_store %arg6[%c0_11, %c0_12], %12 {strides = array<i32>} : memref<9x32xf32, #tpu.memory_space<vmem>>, vector<9x32xf32>,
    return
  }
  func.func @transform_0(%arg0: i32) -> (i32, i32) {
    %c0_i32 = arith.constant 0 : i32
    %c0_i32_0 = arith.constant 0 : i32
    return %c0_i32, %arg0 : i32, i32
  }
  func.func @transform_1(%arg0: i32) -> (i32, i32) {
    %c0_i32 = arith.constant 0 : i32
    %c0_i32_0 = arith.constant 0 : i32
    %c0_i32_1 = arith.constant 0 : i32
    return %c0_i32, %c0_i32_0 : i32, i32
  }
  func.func @transform_2(%arg0: i32) -> (i32, i32) {
    %c0_i32 = arith.constant 0 : i32
    %c0_i32_0 = arith.constant 0 : i32
    %c0_i32_1 = arith.constant 0 : i32
    return %c0_i32, %c0_i32_0 : i32, i32
  }
  func.func @transform_3(%arg0: i32) -> (i32, i32) {
    %c0_i32 = arith.constant 0 : i32
    %c0_i32_0 = arith.constant 0 : i32
    %c0_i32_1 = arith.constant 0 : i32
    return %c0_i32, %c0_i32_0 : i32, i32
  }
  func.func @transform_4(%arg0: i32) -> (i32, i32) {
    %c0_i32 = arith.constant 0 : i32
    %c0_i32_0 = arith.constant 0 : i32
    %c0_i32_1 = arith.constant 0 : i32
    return %c0_i32, %c0_i32_0 : i32, i32
  }
  func.func @transform_5(%arg0: i32) -> (i32, i32) {
    %c0_i32 = arith.constant 0 : i32
    %c0_i32_0 = arith.constant 0 : i32
    return %c0_i32, %arg0 : i32, i32
  }
}

</mosaic_0001>

<bundles_post_ra>
// kernel: tile.8
= control target key start
LH: loop header
LB: loop body
LE: loop exit
PB: predicated region body
PF: predicated region fallthrough
CT: control target
= control target key end

     0   :  { %s22_s0 = inlined_call_operand.vmem [shape: f32[3], index: 0, kind: input, shape index: {}]   ;;  %s23_s1 = inlined_call_operand.vmem [shape: f32[3,3], index: 1, kind: output, shape index: {}]  }
   0x1   :  { %v4_v0 = vld [vmem:[%s22_s0] ss:$0 sm:$0xff] }
   0x2   :  { %5 = vst [vmem:[%s23_s1] sm:$0xf] %v4_v0 }

// kernel: toy_model4_forward.1
= control target key start
LH: loop header
LB: loop body
LE: loop exit
PB: predicated region body
PF: predicated region fallthrough
CT: control target
= control target key end

     0   :  { %vm43_vm0 = vcmask 1040384   ;;  %vm36_vm1 = vcmask 72704   ;;  %vm274_vm2 = vmmov 1   ;;  %v275_v3 = vmov 0   ;;  %s358_s0 = inlined_call_operand.vmem [shape: f32[9,32], index: 0, kind: input, shape index: {}, may-alias: {0,5}]   ;;  %s359_s1 = inlined_call_operand.vmem [shape: f32[9,9], index: 1, kind: input, shape index: {}]   ;;  %s360_s2 = inlined_call_operand.vmem [shape: f32[9,1], index: 2, kind: input, shape index: {}]   ;;  %s361_s3 = inlined_call_operand.vmem [shape: f32[9,9], index: 3, kind: input, shape index: {}]   ;;  %s362_s4 = inlined_call_operand.vmem [shape: f32[9,1], index: 4, kind: input, shape index: {}]   ;;  %s363_s5 = inlined_call_operand.vmem [shape: f32[9,32], index: 5, kind: output, shape index: {}, may-alias: {0,5}]  }
   0x1   :  { %v20_v0 = vld [vmem:[%s358_s0] sm:$0xff]  ;;  %v21_v1 = vld [vmem:[%s358_s0 + $0x8] sm:$0x1]  ;;  %vm312_vm3 = vmpackc.low %vm43_vm0, %vm274_vm2  ;;  %272 = vset.pattern.permute.xlu0 %v275_v3  ;;  %273 = vset.pattern.permute.xlu1 %v275_v3  ;;  %vm224_vm4 = vcmask 253952   ;;  %vm222_vm5 = vcmask 261120  }
   0x2   :  { %v258_v4 = vpack.c.bf16 %v21_v1, %v20_v0  ;;  %v22_v5 = vld [vmem:[%s359_s1] sm:$0xff]  ;;  %v25_v7 = vld [vmem:[%s360_s2 + $0x8] sm:$0x1] }
   0x3   :  { %v24_v6 = vld [vmem:[%s360_s2] sm:$0xff]  ;;  %248 = vmatprep.mubr.msk.f32.mxu0 %vm36_vm1, %v22_v5  ;;  %v23_v8 = vld [vmem:[%s359_s1 + $0x8] sm:$0x1] }
   0x4   :  { %28 = vperm.xlu0 %272, %v24_v6   ;;  %260 = vmatprep.subr.msk.bf16.mxu0 %vm312_vm3, %v258_v4  ;;  %v124_v9 = vld [vmem:[%s361_s3] sm:$0xff]  ;;  %v127_v11 = vld [vmem:[%s362_s4 + $0x8] sm:$0x1] }
   0x5   :  { %263 = vmatpush3.bf16.msk.msra.mxu0 %vm312_vm3, %v258_v4  ;;  %255 = vmatprep.mubr.msk.f32.mxu1 %vm36_vm1, %v124_v9  ;;  %v126_v10 = vld [vmem:[%s362_s4] sm:$0xff]  ;;  %v125_v21 = vld [vmem:[%s361_s3 + $0x8] sm:$0x1] }
   0x6   :  { %130 = vperm.xlu1 %273, %v126_v10  }
   0x8   :  { %33 = vperm.xlu0 %272, %v25_v7   ;;  %249 = vmatmul.mubr.msk.f32.vlgmr.msra.gmra.mrb[0].mxu0 %vm36_vm1, %v23_v8 }
   0xa   :  { %135 = vperm.xlu1 %273, %v127_v11  }
  0x83   :  { %v29_v12 = vpop.permute.xlu0 %28 }
  0x85   :  { %v131_v22 = vpop.permute.xlu1 %130 }
  0x87   :  { %v34_v13 = vpop.permute.xlu0 %33 }
  0x89   :  { %v136_v23 = vpop.permute.xlu1 %135 }
  0xdb   :  { %v250_v14 = vpop.f32.mrb[0].mxu0 }
  0xdc   :  { %v119_v15 = vadd.f32 %v250_v14, %v34_v13  ;;  %v113_v16 = vpop.f32.mrb[1].mxu0 }
  0xdd   :  { %v114_v17 = vadd.f32 %v113_v16, %v29_v12 }
  0xde   :  { %v123_v18 = vmax.f32 %v119_v15, 0.0 }
  0xdf   :  { %v122_v19 = vmax.f32 %v114_v17, 0.0 }
  0xe1   :  { %v264_v20 = vpack.c.bf16 %v123_v18, %v122_v19 }
  0xe3   :  { %266 = vmatprep.subr.msk.bf16.mxu1 %vm312_vm3, %v264_v20 }
  0xe4   :  { %269 = vmatpush3.bf16.msk.msra.mxu1 %vm312_vm3, %v264_v20 }
  0xe7   :  { %256 = vmatmul.mubr.msk.f32.vlgmr.msra.gmra.mrb[0].mxu1 %vm36_vm1, %v125_v21 }
 0x1ba   :  { %v257_v24 = vpop.f32.mrb[0].mxu1 }
 0x1bb   :  { %v219_v25 = vadd.f32 %v257_v24, %v136_v23  ;;  %v213_v26 = vpop.f32.mrb[1].mxu1 }
 0x1bc   :  { %v214_v27 = vadd.f32 %v213_v26, %v131_v22 }
 0x1bd   :  { %225 = vst.msk [vmem:[%s363_s5 + $0x8] sm:$0x1] %vm224_vm4, %v219_v25 }
 0x1be   :  { %223 = vst.msk [vmem:[%s363_s5] sm:$0xff] %vm222_vm5, %v214_v27 }

</bundles_post_ra>
